<compile_context>
chip_gen: v7x
topology: tpu7x:2x2x1
jax: 0.10.0
libtpu: 0.0.40
codegen_flags: <defaults>
</compile_context>

<pallas_src>
import jax
import jax.numpy as jnp
from jax.experimental import pallas as pl
from jax.experimental.pallas import tpu as pltpu


def onenet_kernel(x_ref, wt_ref, b_ref, g_ref, o_ref):
    """Single-invocation kernel (no grid): whole problem lives in VMEM.

    x_ref  : (S, BDp)   bf16 input, time on sublanes, (batch, channel) lanes
    wt_ref : (2P, S)    bf16 [w1 | w2] concatenated over P, pre-transposed
    b_ref  : (2P, BDp)  f32  [b1 ; b2] biases pre-broadcast over lanes
    g_ref  : (1, BDp)   f32  gating parameter weight[d] tiled over batch lanes
    o_ref  : (3P, BDp)  f32  rows [0:P) = gated out, rows [P:3P) = [y1 ; y2]
    """
    P = o_ref.shape[0] // 3

    # Fused dual-branch matmul on the MXU (bf16 in, f32 accumulation), bias
    # added in an f32 epilogue (pre-broadcast, so plain VPU add).
    y_all = jnp.dot(wt_ref[...], x_ref[...],
                    preferred_element_type=jnp.float32) + b_ref[...]

    y1 = y_all[:P]                       # (P, BDp)  -- P multiple of 8
    y2 = y_all[P:]                       # (P, BDp)

    # loss1 = sigmoid(weight), broadcast over the P sublane rows (exp -> EUP).
    loss1 = jax.nn.sigmoid(g_ref[...])   # (1, BDp), f32
    out = y1 * loss1 + y2 * (1.0 - loss1)

    # Single lane-dense writeback of the merged slab.
    o_ref[...] = jnp.concatenate([out, y_all], axis=0).astype(o_ref.dtype)


def onenet_forward(x, w1, b1, w2, b2, weight):
    """x: (B, S, D).  Returns (out, y1, y2), each (B, P, D) float32."""
    B, S, D = x.shape
    P = w1.shape[1]
    BD = B * D
    LANE = 128
    BDp = max(LANE, ((BD + LANE - 1) // LANE) * LANE)

    # --- layout plumbing (cheap XLA ops outside the kernel) ----------------
    # time axis -> sublanes; (batch, channel) -> lanes (lane index = b*D + d);
    # lane axis zero-padded to a multiple of 128 for unmasked stores.
    x2d = jnp.transpose(x, (1, 0, 2)).reshape(S, BD)
    x2d = jnp.pad(x2d, ((0, 0), (0, BDp - BD))).astype(jnp.bfloat16)   # (S, BDp)

    w_cat_t = jnp.concatenate([w1, w2], axis=1).T.astype(jnp.bfloat16)  # (2P, S)

    b_cat = jnp.concatenate([b1, b2]).reshape(2 * P, 1).astype(jnp.float32)
    b_bcast = jnp.broadcast_to(b_cat, (2 * P, BDp))                     # (2P, BDp)

    gate = jnp.tile(weight, B)                                          # (BD,)
    gate = jnp.pad(gate, (0, BDp - BD)).reshape(1, BDp).astype(jnp.float32)

    cost = pl.CostEstimate(
        flops=2 * (2 * P) * S * BDp,
        transcendentals=BDp,
        bytes_accessed=(x2d.size * 2 + w_cat_t.size * 2
                        + b_bcast.size * 4 + gate.size * 4
                        + 3 * P * BDp * 4),
    )

    slab = pl.pallas_call(
        onenet_kernel,
        out_shape=jax.ShapeDtypeStruct((3 * P, BDp), jnp.float32),
        in_specs=[pl.BlockSpec(memory_space=pltpu.MemorySpace.VMEM)] * 4,
        out_specs=pl.BlockSpec(memory_space=pltpu.MemorySpace.VMEM),
        cost_estimate=cost,
    )(x2d, w_cat_t, b_bcast, gate)

    out2d = slab[:P, :BD]
    y1_2d = slab[P:2 * P, :BD]
    y2_2d = slab[2 * P:, :BD]

    # --- back to the PyTorch (B, P, D) convention ---------------------------
    def to_bpd(a):
        return jnp.transpose(a.reshape(P, B, D), (1, 0, 2))

    return to_bpd(out2d), to_bpd(y1_2d), to_bpd(y2_2d)


if __name__ == "__main__":
    # Small shapes consistent with the module: batch=2, seq_len=16,
    # pred_len=8, enc_in=4.
    B, S, P, D = 2, 16, 8, 4

    key = jax.random.PRNGKey(0)
    kx, k1, k2, k3, k4, kw = jax.random.split(key, 6)

    x = jax.random.normal(kx, (B, S, D), dtype=jnp.float32)

    # Synthetic backbone parameters (deterministic).
    w1 = jax.random.normal(k1, (S, P), dtype=jnp.float32) * 0.1
    b1 = jax.random.normal(k2, (P,), dtype=jnp.float32) * 0.1
    w2 = jax.random.normal(k3, (S, P), dtype=jnp.float32) * 0.1
    b2 = jax.random.normal(k4, (P,), dtype=jnp.float32) * 0.1

    # OneNet gating parameter is nn.Parameter(torch.zeros(enc_in)) at init;
    # use a small nonzero value here so the sigmoid gating path is exercised.
    weight = jax.random.normal(kw, (D,), dtype=jnp.float32) * 0.3

    out, y1, y2 = onenet_forward(x, w1, b1, w2, b2, weight)
    jax.block_until_ready((out, y1, y2))

    # Pure-JAX f32 reference check (kernel matmul runs in bf16 with f32
    # accumulation, so use a bf16-appropriate tolerance).
    y1_ref = jnp.einsum("bsd,sp->bpd", x, w1) + b1[None, :, None]
    y2_ref = jnp.einsum("bsd,sp->bpd", x, w2) + b2[None, :, None]
    loss1 = jax.nn.sigmoid(weight)[None, None, :]
    out_ref = y1_ref * loss1 + y2_ref * (1.0 - loss1)

    assert jnp.allclose(y1, y1_ref, atol=2e-2), "y1 mismatch"
    assert jnp.allclose(y2, y2_ref, atol=2e-2), "y2 mismatch"
    assert jnp.allclose(out, out_ref, atol=2e-2), "out mismatch"

    print("KERNEL_OK")
</pallas_src>

<mosaic_0001>
module attributes {stable_mosaic.version = 11 : i64} {
  func.func @onenet_kernel(%arg0: memref<16x128xbf16, #tpu.memory_space<vmem>>, %arg1: memref<16x16xbf16, #tpu.memory_space<vmem>>, %arg2: memref<16x128xf32, #tpu.memory_space<vmem>>, %arg3: memref<1x128xf32, #tpu.memory_space<vmem>>, %arg4: memref<24x128xf32, #tpu.memory_space<vmem>>) attributes {dimension_semantics = [], scalar_prefetch = 0 : i64, scratch_operands = 0 : i64, tpu.core_type = #tpu.core_type<tc>} {
    %c0 = arith.constant 0 : index
    %c0_0 = arith.constant 0 : index
    %0 = vector.load %arg1[%c0, %c0_0] : memref<16x16xbf16, #tpu.memory_space<vmem>>, vector<16x16xbf16>
    %c0_1 = arith.constant 0 : index
    %c0_2 = arith.constant 0 : index
    %1 = vector.load %arg0[%c0_1, %c0_2] : memref<16x128xbf16, #tpu.memory_space<vmem>>, vector<16x128xbf16>
    %cst = arith.constant dense<0.000000e+00> : vector<16x128xf32>
    %2 = tpu.matmul %0, %1, %cst {dimension_numbers = #tpu.dot_dimension_numbers<[1], [0], [0], [1], [0, 0, 1, 1], [], []>} : vector<16x16xbf16>, vector<16x128xbf16>, vector<16x128xf32> -> vector<16x128xf32>
    %c0_3 = arith.constant 0 : index
    %c0_4 = arith.constant 0 : index
    %3 = vector.load %arg2[%c0_3, %c0_4] : memref<16x128xf32, #tpu.memory_space<vmem>>, vector<16x128xf32>
    %4 = arith.addf %2, %3 : vector<16x128xf32>
    %5 = vector.extract_strided_slice %4 {offsets = [0, 0], sizes = [8, 128], strides = [1, 1]} : vector<16x128xf32> to vector<8x128xf32>
    %6 = vector.extract_strided_slice %4 {offsets = [8, 0], sizes = [8, 128], strides = [1, 1]} : vector<16x128xf32> to vector<8x128xf32>
    %c0_5 = arith.constant 0 : index
    %c0_6 = arith.constant 0 : index
    %7 = vector.load %arg3[%c0_5, %c0_6] : memref<1x128xf32, #tpu.memory_space<vmem>>, vector<1x128xf32>
    %8 = arith.negf %7 : vector<1x128xf32>
    %9 = math.exp %8 : vector<1x128xf32>
    %cst_7 = arith.constant 1.000000e+00 : f32
    %10 = vector.broadcast %cst_7 : f32 to vector<1x128xf32>
    %11 = arith.addf %10, %9 : vector<1x128xf32>
    %12 = arith.divf %10, %11 : vector<1x128xf32>
    %13 = vector.broadcast %12 : vector<1x128xf32> to vector<8x128xf32>
    %14 = arith.mulf %5, %13 : vector<8x128xf32>
    %cst_8 = arith.constant 1.000000e+00 : f32
    %15 = vector.broadcast %cst_8 : f32 to vector<1x128xf32>
    %16 = arith.subf %15, %12 : vector<1x128xf32>
    %17 = vector.broadcast %16 : vector<1x128xf32> to vector<8x128xf32>
    %18 = arith.mulf %6, %17 : vector<8x128xf32>
    %19 = arith.addf %14, %18 : vector<8x128xf32>
    %20 = tpu.concatenate %19, %4 in 0 : vector<8x128xf32>, vector<16x128xf32> -> vector<24x128xf32>
    %c0_9 = arith.constant 0 : index
    %c0_10 = arith.constant 0 : index
    %21 = vector.load %arg4[%c0_9, %c0_10] : memref<24x128xf32, #tpu.memory_space<vmem>>, vector<24x128xf32>
    tpu.vector_store %arg4[%c0_9, %c0_10], %20 {strides = array<i32>} : memref<24x128xf32, #tpu.memory_space<vmem>>, vector<24x128xf32>,
    return
  }
}

</mosaic_0001>

<bundles_post_ra>
// kernel: tpu_custom_call.1
= control target key start
LH: loop header
LB: loop body
LE: loop exit
PB: predicated region body
PF: predicated region fallthrough
CT: control target
= control target key end

     0   :  { %9 = vsyncpa [#allocation3], 0  ;;  %s387_s0 = inlined_call_operand.hbm [shape: bf16[16,128], index: 0, kind: input, shape index: {}]   ;;  %s388_s1 = inlined_call_operand.hbm [shape: bf16[16,16], index: 1, kind: input, shape index: {}]   ;;  %s389_s2 = inlined_call_operand.hbm [shape: f32[16,128], index: 2, kind: input, shape index: {}]   ;;  %s390_s3 = inlined_call_operand.vmem [shape: f32[1,128], index: 3, kind: input, shape index: {}]   ;;  %s391_s4 = inlined_call_operand.hbm [shape: f32[24,128], index: 4, kind: output, shape index: {}]  }
   0x1   :  { %10 = vsyncpa [#allocation6], 0 }
   0x2   :  { %11 = vsyncpa [#allocation4], 0  ;;  %s288_s15 = smov [#allocation5]   ;;  %s289_s17 = smov [#allocation2]  }
   0x3   :  { %s29_s16 = sshll.u32 %s288_s15, 4  ;;  %s17_s18 = sshll.u32 %s289_s17, 4  ;;  %s30_s16 = int_to_ptr.vmem [resolvable:$true] %s29_s16  ;;  %s323_s18 = int_to_ptr.vmem [resolvable:$true] %s17_s18 }
   0x4   :  { %s194_s21 = scalar_lea.hbm %s388_s1, 128 }
   0x5   :  { %p195_p0 = scmp.ne.s32.totalorder %s388_s1, %s194_s21  ;;  %p198_p1 = scmp.lt.u32.totalorder %s194_s21, %s388_s1 }
   0x7   :  { %p200_p2 = pnand %p198_p1, %p195_p0 }
   0x9   :  { %203 = shalt.err (!%p200_p2)
}
   0xa   :  { %s204_s26 = scalar_lea.vmem %s30_s16, 128  ;;  %p209_p4 = scmp.lt.s32.totalorder %s30_s16, %s30_s16 }
   0xb   :  { %p205_p3 = scmp.ne.s32.totalorder %s30_s16, %s204_s26  ;;  %p210_p5 = scmp.lt.s32.totalorder %s204_s26, %s204_s26 }
   0xd   :  { %p211_p6 = por %p210_p5, %p209_p4 }
   0xf   :  { %p212_p7 = pnand %p211_p6, %p205_p3 }
  0x11   :  { %215 = shalt.err (!%p212_p7)
}
  0x12   :  { %s290_s27 = smov 64   ;;  %s291_s28 = smov 4  }
  0x13   :  { %35 = dma.hbm_to_vmem [thread:$0]  %s388_s1, 128, %s30_s16, [#allocation6], %s290_s27, %s290_s27, %s291_s28  }
  0x14   :  { %s216_s7 = scalar_lea.hbm %s387_s0, 128 }
  0x15   :  { %p217_p8 = scmp.ne.s32.totalorder %s387_s0, %s216_s7  ;;  %p220_p9 = scmp.lt.u32.totalorder %s216_s7, %s387_s0 }
  0x17   :  { %p222_p10 = pnand %p220_p9, %p217_p8 }
  0x19   :  { %225 = shalt.err (!%p222_p10)
}
  0x1a   :  { %s226_s12 = scalar_lea.vmem %s323_s18, 128  ;;  %p231_p12 = scmp.lt.s32.totalorder %s323_s18, %s323_s18 }
  0x1b   :  { %p227_p11 = scmp.ne.s32.totalorder %s323_s18, %s226_s12  ;;  %p232_p13 = scmp.lt.s32.totalorder %s226_s12, %s226_s12 }
  0x1d   :  { %p233_p0 = por %p232_p13, %p231_p12 }
  0x1f   :  { %p234_p1 = pnand %p233_p0, %p227_p11 }
  0x21   :  { %237 = shalt.err (!%p234_p1)
}
  0x22   :  { %23 = dma.hbm_to_vmem [thread:$0]  %s387_s0, 128, %s323_s18, [#allocation3], %s290_s27, %s290_s27, %s291_s28  }
  0x23   :  { %s292_s14 = smov [#allocation7]   ;;  %s238_s19 = scalar_lea.hbm %s389_s2, 256 }
  0x24   :  { %s41_s15 = sshll.u32 %s292_s14, 4  ;;  %p239_p2 = scmp.ne.s32.totalorder %s389_s2, %s238_s19  ;;  %s42_s15 = int_to_ptr.vmem [resolvable:$true] %s41_s15 }
  0x25   :  { %p242_p3 = scmp.lt.u32.totalorder %s238_s19, %s389_s2 }
  0x27   :  { %p244_p4 = pnand %p242_p3, %p239_p2 }
  0x29   :  { %247 = shalt.err (!%p244_p4)
}
  0x2a   :  { %s248_s24 = scalar_lea.vmem %s42_s15, 256  ;;  %p253_p6 = scmp.lt.s32.totalorder %s42_s15, %s42_s15 }
  0x2b   :  { %p249_p5 = scmp.ne.s32.totalorder %s42_s15, %s248_s24  ;;  %p254_p7 = scmp.lt.s32.totalorder %s248_s24, %s248_s24 }
  0x2d   :  { %p255_p8 = por %p254_p7, %p253_p6 }
  0x2f   :  { %p256_p9 = pnand %p255_p8, %p249_p5 }
  0x31   :  { %259 = shalt.err (!%p256_p9)
}
  0x32   :  { %s293_s0 = smov 128   ;;  %s294_s18 = smov 8  }
  0x33   :  { %47 = dma.hbm_to_vmem [thread:$0]  %s389_s2, 256, %s42_s15, [#allocation6], %s293_s0, %s293_s0, %s294_s18  }
  0x34   :  { %282 = dma.done.wait [#allocation3], 128  }
  0x35   :  { %283 = vsyncadd [#allocation3], 4294967168 }
  0x36   :  { %284 = dma.done.wait [#allocation6], 384  }
  0x37   :  { %285 = vsyncadd [#allocation6], 4294966912  ;;  %v295_v0 = vmov 0.0   ;;  %vm296_vm0 = vmmov 0   ;;  %v188_v1 = vld [vmem:[#allocation2] sm:$0xff]   ;;  %v189_v2 = vld [vmem:[#allocation5] sm:$0xff]   ;;  %v130_v7 = vlaneseq }
  0x38   :  { %172 = vmatprep.subr.bf16.mxu0 %v295_v0  ;;  %174 = vmatprep.mubr.msk.bf16.mxu0 %vm296_vm0, %v295_v0  ;;  %vm77_vm1 = vcmask 130048   ;;  %v122_v3 = vld [vmem:[%s390_s3] sm:$0x1]  ;;  %v64_v12 = vld [vmem:[#allocation7] sm:$0xff]  ;;  %v65_v14 = vld [vmem:[#allocation7 + $0x8] sm:$0xff]  ;;  %s297_s2 = smov [#allocation8]  }
  0x39   :  { %173 = vmatpush3.bf16.msra.mxu0 %v188_v1  ;;  %v169_v4 = vmul.f32 -1.442695, %v122_v3  ;;  %v131_v8 = vshrl.u32 %v130_v7, 7  ;;  %s153_s3 = sshll.u32 %s297_s2, 4  ;;  %s154_s3 = int_to_ptr.vmem [resolvable:$true] %s153_s3 }
  0x3a   :  { %s260_s29 = scalar_lea.vmem %s154_s3, 384  ;;  %p265_p11 = scmp.lt.s32.totalorder %s154_s3, %s154_s3 }
  0x3b   :  { %190 = vpow2.f32 %v169_v4  ;;  %v132_v10 = vsub.s32 0, %v131_v8  ;;  %p261_p10 = scmp.ne.s32.totalorder %s154_s3, %s260_s29  ;;  %p266_p12 = scmp.lt.s32.totalorder %s260_s29, %s260_s29 }
  0x3c   :  { %175 = vmatmul.mubr.msk.bf16.vlgmr.msra.gmra.mrb[0].mxu0 %vm77_vm1, %v189_v2 }
  0x3d   :  { %p267_p13 = por %p266_p12, %p265_p11 }
  0x3f   :  { %p268_p0 = pnand %p267_p13, %p261_p10 }
  0x45   :  { %v191_v5 = vpop.eup %190 }
  0x46   :  { %v126_v6 = vadd.f32 1.0, %v191_v5 }
  0x48   :  { %192 = vrcp.f32 %v126_v6 }
  0x52   :  { %v193_v9 = vpop.eup %192 }
  0x53   :  { %v136_v11 = vsub.f32 1.0, %v193_v9  ;;  %v133_v16 = vrot.slane %v193_v9, %v132_v10 }
  0x55   :  { %v141_v18 = vrot.slane %v136_v11, %v132_v10 }
 0x10f   :  { %v115_v13 = vpop.f32.mrb[0].mxu0 }
 0x110   :  { %v116_v15 = vadd.f32 %v115_v13, %v64_v12  ;;  %v176_v17 = vpop.f32.mrb[1].mxu0 }
 0x111   :  { %v118_v19 = vpop.f32.mrb[2].mxu0 }
 0x112   :  { %146 = vst [vmem:[#allocation8 + $0x8] sm:$0xff] %v116_v15  ;;  %v119_v20 = vadd.f32 %v118_v19, %v65_v14  ;;  %v177_v21 = vpop.f32.mrb[3].mxu0  ;;  %v135_v22 = vmul.f32 %v133_v16, %v116_v15 }
 0x114   :  { %v143_v23 = vmul.f32 %v141_v18, %v119_v20  ;;  %147 = vst [vmem:[#allocation8 + $0x10] sm:$0xff] %v119_v20 }
 0x116   :  { %v144_v24 = vadd.f32 %v143_v23, %v135_v22 }
 0x118   :  { %145 = vst [vmem:[#allocation8] sm:$0xff] %v144_v24 }
 0x119   :  { %271 = shalt.err (!%p268_p0)
}
 0x11a   :  { %s272_s6 = scalar_lea.hbm %s391_s4, 384 }
 0x11b   :  { %p273_p1 = scmp.ne.s32.totalorder %s391_s4, %s272_s6  ;;  %p276_p2 = scmp.lt.u32.totalorder %s272_s6, %s391_s4 }
 0x11d   :  { %p278_p3 = pnand %p276_p2, %p273_p1 }
 0x11f   :  { %281 = shalt.err (!%p278_p3)
}
 0x120   :  { %159 = dma.vmem_to_hbm [thread:$0]  %s154_s3, 384, %s391_s4, [#allocation4], %s293_s0, %s293_s0, %s294_s18  }
 0x121   :  { %286 = dma.done.wait [#allocation4], 384  }
 0x122   :  { %287 = vsyncadd [#allocation4], 4294966912 }
 0x123   :  { %163 = vsyncpa [#allocation3], 1 }
 0x124   :  { %164 = vsyncpa [#allocation6], 1 }
 0x125   :  { %165 = vsyncpa [#allocation4], 1 }

</bundles_post_ra>
